<compile_context>
chip_gen: v7x
topology: tpu7x:2x2x1
jax: 0.10.0
libtpu: 0.0.40
codegen_flags: <defaults>
</compile_context>

<pallas_src>
import functools

import jax
import jax.numpy as jnp
from jax import lax
from jax.experimental import pallas as pl
from jax.experimental.pallas import tpu as pltpu


# ---------------------------------------------------------------------------
# PhaseShuffle Pallas kernels
# ---------------------------------------------------------------------------
def _shuffle_row(x, s, lane, rad):
    """Shift one (C, T) row by `s` with symmetric (flip+cat) edge reflection.

    x    : (C, T) value
    s    : traced int32 scalar, |s| <= rad < T
    lane : (1, T) int32 lane-index iota (hoisted by the caller)
    rad  : static Python int
    """
    t = x.shape[-1]
    # Bulk shift on the XLU: rolled[:, j] = x[:, (j - s) mod T].
    sm = jnp.where(s < 0, s + t, s).astype(jnp.int32)
    out = pltpu.roll(x, sm, 1)
    # Reflected-edge fix-up.  Parameterized so the SOURCE column is a static
    # slice and only the destination lane is dynamic: each patched column is
    # one static (C,1) slice + one VPU select -- no cross-lane reductions.
    # At most `rad` columns per side are wrapped (|s| <= rad).
    for k in range(rad):
        # Left edge (s > 0): out[:, s - 1 - k] = x[:, k]         for k < s.
        out = jnp.where(jnp.logical_and(k < s, lane == s - 1 - k),
                        x[:, k:k + 1], out)
        # Right edge (s < 0): out[:, T + s + k] = x[:, T - 1 - k] for k < -s.
        out = jnp.where(jnp.logical_and(k < -s, lane == t + s + k),
                        x[:, t - 1 - k:t - k], out)
    return out


def _phase_shuffle_kernel(shifts_ref, x_ref, o_ref, *, rad):
    """Full output: o[b] = phase_shuffle(x[b], shifts[b])."""
    block_b, _, t = x_ref.shape
    base = pl.program_id(0) * block_b
    lane = lax.broadcasted_iota(jnp.int32, (1, t), 1)   # loop-invariant

    def body(r, carry):
        s = shifts_ref[base + r]                        # SMEM scalar
        o_ref[r] = _shuffle_row(x_ref[r], s, lane, rad).astype(o_ref.dtype)
        return carry

    lax.fori_loop(0, block_b, body, None)               # bounded live ranges


def _phase_shuffle_pool_kernel(shifts_ref, x_ref, o_ref, *, rad):
    """Fused phase-shuffle + AdaptiveAvgPool1d(1): o[b,:,0]=mean_t(shuffled)."""
    block_b, _, t = x_ref.shape
    base = pl.program_id(0) * block_b
    lane = lax.broadcasted_iota(jnp.int32, (1, t), 1)
    inv_t = jnp.float32(1.0) / jnp.float32(t)

    def body(r, carry):
        s = shifts_ref[base + r]
        out = _shuffle_row(x_ref[r], s, lane, rad)
        pooled = jnp.sum(out.astype(jnp.float32), axis=-1, keepdims=True) * inv_t
        o_ref[r] = pooled.astype(o_ref.dtype)
        return carry

    lax.fori_loop(0, block_b, body, None)


def _choose_block_b(batch, row_bytes, max_block_bytes):
    """Largest divisor of `batch` fitting the byte budget, keeping grid >= 2
    (and preferring an even grid) so v7x's two TensorCores stay busy."""
    divs = [d for d in range(1, batch + 1)
            if batch % d == 0 and d * row_bytes <= max_block_bytes]
    if not divs:
        divs = [1]
    if batch >= 2:
        multi = [d for d in divs if batch // d >= 2]
        if multi:
            divs = multi
    even = [d for d in divs if (batch // d) % 2 == 0]
    return max(even) if even else max(divs)


def _phase_shuffle_call(x, shifts, rad, pooled, max_block_bytes):
    B, C, T = x.shape
    if not (0 < rad < T):
        raise ValueError(f"need 0 < rad < T, got rad={rad}, T={T}")
    if shifts.shape != (B,):
        raise ValueError("shifts must have shape (B,)")
    # Kernel only patches `rad` wrapped columns; enforce the invariant.
    shifts = jnp.clip(shifts.astype(jnp.int32), -rad, rad)

    itemsize = x.dtype.itemsize
    row_bytes = C * T * itemsize
    block_b = _choose_block_b(B, row_bytes, max_block_bytes)

    if pooled:
        kernel = functools.partial(_phase_shuffle_pool_kernel, rad=rad)
        out_shape = jax.ShapeDtypeStruct((B, C, 1), x.dtype)
        out_spec = pl.BlockSpec((block_b, C, 1), lambda i, sh: (i, 0, 0))
        bytes_accessed = B * C * T * itemsize + B * C * itemsize
    else:
        kernel = functools.partial(_phase_shuffle_kernel, rad=rad)
        out_shape = jax.ShapeDtypeStruct((B, C, T), x.dtype)
        out_spec = pl.BlockSpec((block_b, C, T), lambda i, sh: (i, 0, 0))
        bytes_accessed = 2 * B * C * T * itemsize

    return pl.pallas_call(
        kernel,
        out_shape=out_shape,
        grid_spec=pltpu.PrefetchScalarGridSpec(
            num_scalar_prefetch=1,
            grid=(B // block_b,),
            in_specs=[pl.BlockSpec((block_b, C, T),
                                   lambda i, sh: (i, 0, 0))],
            out_specs=out_spec,
        ),
        compiler_params=pltpu.CompilerParams(
            dimension_semantics=("parallel",)),
        cost_estimate=pl.CostEstimate(
            flops=0, transcendentals=0, bytes_accessed=bytes_accessed),
    )(shifts, x)


def phase_shuffle(x, shifts, rad, *, max_block_bytes=2 * 1024 * 1024):
    """x: (B, C, T); shifts: (B,) int with |shift| <= rad < T -> (B, C, T)."""
    return _phase_shuffle_call(x, shifts, rad, pooled=False,
                               max_block_bytes=max_block_bytes)


def phase_shuffle_pooled(x, shifts, rad, *, max_block_bytes=2 * 1024 * 1024):
    """Fused phase-shuffle + mean over time -> (B, C); no (B,C,T) HBM write."""
    out = _phase_shuffle_call(x, shifts, rad, pooled=True,
                              max_block_bytes=max_block_bytes)
    return out[..., 0]


class PhaseShuffle:
    """JAX counterpart of the torch PhaseShuffle module (explicit PRNG key)."""

    def __init__(self, rad):
        self.rad = rad

    def _shifts(self, key, batch):
        return jax.random.randint(key, (batch,), -self.rad, self.rad + 1,
                                  dtype=jnp.int32)

    def __call__(self, x, key):
        if self.rad == 0:
            return x
        return phase_shuffle(x, self._shifts(key, x.shape[0]), self.rad)

    def pooled(self, x, key):
        """phase_shuffle followed by AdaptiveAvgPool1d(1), fused in-kernel."""
        if self.rad == 0:
            return jnp.mean(x, axis=-1)
        return phase_shuffle_pooled(x, self._shifts(key, x.shape[0]), self.rad)


def _phase_shuffle_reference(x, shifts):
    """Pure-JAX reference of the torch flip+cat loop (symmetric reflection)."""
    _, _, T = x.shape

    def one(xi, s):
        idx = jnp.arange(T) - s
        idx = jnp.where(idx < 0, -idx - 1, idx)            # left edge, flipped
        idx = jnp.where(idx >= T, 2 * T - 1 - idx, idx)    # right edge, flipped
        return xi[:, idx]

    return jax.vmap(one)(x, shifts)


# ---------------------------------------------------------------------------
# Rest of the discriminator forward (dense ops left to XLA)
# ---------------------------------------------------------------------------
def _leaky_relu(x, negative_slope=0.2):
    return jnp.where(x >= 0, x, negative_slope * x)


def _spectral_normalize(w, n_iter=3, eps=1e-12):
    # TODO(synk): nn.utils.spectral_norm keeps a persistent power-iteration
    # vector `u` across forward passes; here it is re-estimated per call.
    o = w.shape[0]
    w2 = w.reshape(o, -1)
    u = jnp.ones((o,), w.dtype) / jnp.sqrt(jnp.asarray(o, w.dtype))
    v = w2.T @ u
    for _ in range(n_iter):
        v = w2.T @ u
        v = v / (jnp.linalg.norm(v) + eps)
        u = w2 @ v
        u = u / (jnp.linalg.norm(u) + eps)
    sigma = u @ (w2 @ v)
    return w / (sigma + eps)


def _conv1d(x, w, b, stride=4, padding=11):
    # x: (B, Cin, L), w: (Cout, Cin, K), b: (Cout,)
    y = lax.conv_general_dilated(
        x, w, window_strides=(stride,), padding=[(padding, padding)],
        dimension_numbers=("NCH", "OIH", "NCH"))
    return y + b[None, :, None]


class BassGANDiscriminator:
    """Forward pass of the torch BassGANDiscriminator.

    The custom PhaseShuffle op (fused with the global average pool) runs as
    the Pallas kernel above.
    """
    # TODO(synk): Conv1d + spectral_norm and the final Linear are implemented
    # with standard XLA ops (lax.conv_general_dilated / jnp), not Pallas.

    def __init__(self, key, channels=(11, 64, 128, 256, 512),
                 phase_shuffle_rad=2, kernel_size=25):
        self.channels = tuple(channels)
        self.phase_shuffle = PhaseShuffle(phase_shuffle_rad)
        self.conv_params = []
        for i in range(len(channels) - 1):
            key, kw = jax.random.split(key)
            fan_in = channels[i] * kernel_size
            w = jax.random.normal(
                kw, (channels[i + 1], channels[i], kernel_size),
                dtype=jnp.float32) / jnp.sqrt(jnp.float32(fan_in))
            b = jnp.zeros((channels[i + 1],), jnp.float32)
            self.conv_params.append((w, b))
        key, kw = jax.random.split(key)
        self.fc_w = jax.random.normal(
            kw, (1, channels[-1]),
            dtype=jnp.float32) / jnp.sqrt(jnp.float32(channels[-1]))
        self.fc_b = jnp.zeros((1,), jnp.float32)

    def __call__(self, bass, cond, key, return_features=False):
        x = jnp.concatenate([bass, cond], axis=1)
        for w, b in self.conv_params:
            x = _conv1d(x, _spectral_normalize(w), b)
            x = _leaky_relu(x, 0.2)
        # Fused phase-shuffle + AdaptiveAvgPool1d(1): the (B, C, T) shuffled
        # features never round-trip through HBM.
        pooled = self.phase_shuffle.pooled(x, key)          # (B, C)
        score = pooled @ self.fc_w.T + self.fc_b
        if return_features:
            return pooled, score
        return score


if __name__ == "__main__":
    key = jax.random.PRNGKey(0)
    k_x, k_disc, k_bass, k_cond, k_ps = jax.random.split(key, 5)

    # --- 1. Standalone PhaseShuffle kernel check (lane/sublane-dense shapes,
    #        deterministic shifts covering negative / zero / positive;
    #        block_b=2 -> grid=2 exercises the multi-block path). ---
    B, C, T, rad = 4, 16, 256, 2
    x = jax.random.normal(k_x, (B, C, T), dtype=jnp.float32)
    shifts = jnp.array([-2, -1, 0, 2], dtype=jnp.int32)
    out = jax.block_until_ready(phase_shuffle(x, shifts, rad))
    ref = _phase_shuffle_reference(x, shifts)
    assert out.shape == (B, C, T)
    assert jnp.allclose(out, ref, atol=1e-6), "phase shuffle mismatch"

    # --- 2. Fused phase-shuffle + mean-pool kernel check. ---
    pooled_k = jax.block_until_ready(phase_shuffle_pooled(x, shifts, rad))
    pooled_ref = jnp.mean(ref, axis=-1)
    assert pooled_k.shape == (B, C)
    assert jnp.allclose(pooled_k, pooled_ref, atol=1e-5), "pooled mismatch"

    # --- 3. Small end-to-end discriminator forward.
    #        in_length=32768 -> conv stack (stride 4 x4) -> T=128 features,
    #        so the Pallas phase-shuffle sees a lane-aligned block; B=2 gives
    #        block_b=1 / grid=2 ("parallel" batch axis). ---
    disc = BassGANDiscriminator(k_disc, channels=(3, 8, 16, 16, 16),
                                phase_shuffle_rad=2)
    bass = jax.random.normal(k_bass, (2, 2, 32768), dtype=jnp.float32)
    cond = jax.random.normal(k_cond, (2, 1, 32768), dtype=jnp.float32)
    pooled, score = disc(bass, cond, k_ps, return_features=True)
    score = jax.block_until_ready(score)
    assert score.shape == (2, 1)
    assert pooled.shape == (2, 16)
    assert bool(jnp.all(jnp.isfinite(score)))

    print("KERNEL_OK")
</pallas_src>

<mosaic_0001>
module attributes {stable_mosaic.version = 11 : i64} {
  func.func @_phase_shuffle_kernel(%arg0: i32, %arg1: memref<4xi32, #tpu.memory_space<smem>>, %arg2: memref<2x16x256xf32, #tpu.memory_space<vmem>>, %arg3: memref<2x16x256xf32, #tpu.memory_space<vmem>>) attributes {dimension_semantics = [#tpu.dimension_semantics<parallel>], iteration_bounds = array<i64: 2>, scalar_prefetch = 1 : i64, scratch_operands = 0 : i64, tpu.core_type = #tpu.core_type<tc>, window_params = [{transform_indices = @transform_0, window_bounds = array<i64: 2, 16, 256>}, {transform_indices = @transform_1, window_bounds = array<i64: 2, 16, 256>}]} {
    %c2_i32 = arith.constant 2 : i32
    %0 = arith.muli %arg0, %c2_i32 : i32
    %1 = tpu.iota {dimensions = array<i32: 1>} : vector<1x256xi32>
    %c0_i32 = arith.constant 0 : i32
    %c2_i32_0 = arith.constant 2 : i32
    %2 = arith.addi %c0_i32, %c2_i32_0 : i32
    %c1_i32 = arith.constant 1 : i32
    scf.for %arg4 = %c0_i32 to %2 step %c1_i32  : i32 {
      %3 = arith.addi %0, %arg4 : i32
      %4 = arith.index_cast %3 : i32 to index
      %5 = memref.load %arg1[%4] : memref<4xi32, #tpu.memory_space<smem>>
      %6 = arith.index_cast %arg4 : i32 to index
      %c0 = arith.constant 0 : index
      %c0_2 = arith.constant 0 : index
      %7 = vector.load %arg2[%6, %c0, %c0_2] : memref<2x16x256xf32, #tpu.memory_space<vmem>>, vector<1x16x256xf32>
      %8 = vector.shape_cast %7 : vector<1x16x256xf32> to vector<16x256xf32>
      %c0_i32_3 = arith.constant 0 : i32
      %9 = arith.cmpi slt, %5, %c0_i32_3 : i32
      %c256_i32 = arith.constant 256 : i32
      %10 = arith.addi %5, %c256_i32 : i32
      %11 = arith.select %9, %10, %5 : i32
      %12 = tpu.dynamic_rotate %8 by %11 dim 1 : vector<16x256xf32>, i32 -> vector<16x256xf32>
      %c0_i32_4 = arith.constant 0 : i32
      %13 = arith.cmpi sgt, %5, %c0_i32_4 : i32
      %c1_i32_5 = arith.constant 1 : i32
      %14 = arith.subi %5, %c1_i32_5 : i32
      %c0_i32_6 = arith.constant 0 : i32
      %15 = arith.subi %14, %c0_i32_6 : i32
      %16 = vector.broadcast %15 : i32 to vector<1x256xi32>
      %17 = arith.cmpi eq, %1, %16 : vector<1x256xi32>
      %18 = vector.broadcast %13 : i1 to vector<1x256xi1>
      %19 = arith.andi %18, %17 : vector<1x256xi1>
      %20 = vector.extract_strided_slice %8 {offsets = [0, 0], sizes = [16, 1], strides = [1, 1]} : vector<16x256xf32> to vector<16x1xf32>
      %21 = vector.shape_cast %19 : vector<1x256xi1> to vector<1x256xi1>
      %22 = vector.broadcast %21 : vector<1x256xi1> to vector<16x256xi1>
      %23 = vector.shape_cast %20 : vector<16x1xf32> to vector<16x1xf32>
      %24 = vector.broadcast %23 : vector<16x1xf32> to vector<16x256xf32>
      %25 = arith.select %22, %24, %12 : vector<16x256xi1>, vector<16x256xf32>
      %c0_i32_7 = arith.constant 0 : i32
      %26 = arith.subi %c0_i32_7, %5 : i32
      %c0_i32_8 = arith.constant 0 : i32
      %27 = arith.cmpi sgt, %26, %c0_i32_8 : i32
      %c256_i32_9 = arith.constant 256 : i32
      %28 = arith.addi %c256_i32_9, %5 : i32
      %c0_i32_10 = arith.constant 0 : i32
      %29 = arith.addi %28, %c0_i32_10 : i32
      %30 = vector.broadcast %29 : i32 to vector<1x256xi32>
      %31 = arith.cmpi eq, %1, %30 : vector<1x256xi32>
      %32 = vector.broadcast %27 : i1 to vector<1x256xi1>
      %33 = arith.andi %32, %31 : vector<1x256xi1>
      %34 = vector.extract_strided_slice %8 {offsets = [0, 255], sizes = [16, 1], strides = [1, 1]} : vector<16x256xf32> to vector<16x1xf32>
      %35 = vector.shape_cast %33 : vector<1x256xi1> to vector<1x256xi1>
      %36 = vector.broadcast %35 : vector<1x256xi1> to vector<16x256xi1>
      %37 = vector.shape_cast %34 : vector<16x1xf32> to vector<16x1xf32>
      %38 = vector.broadcast %37 : vector<16x1xf32> to vector<16x256xf32>
      %39 = arith.select %36, %38, %25 : vector<16x256xi1>, vector<16x256xf32>
      %c1_i32_11 = arith.constant 1 : i32
      %40 = arith.cmpi sgt, %5, %c1_i32_11 : i32
      %c1_i32_12 = arith.constant 1 : i32
      %41 = arith.subi %5, %c1_i32_12 : i32
      %c1_i32_13 = arith.constant 1 : i32
      %42 = arith.subi %41, %c1_i32_13 : i32
      %43 = vector.broadcast %42 : i32 to vector<1x256xi32>
      %44 = arith.cmpi eq, %1, %43 : vector<1x256xi32>
      %45 = vector.broadcast %40 : i1 to vector<1x256xi1>
      %46 = arith.andi %45, %44 : vector<1x256xi1>
      %47 = vector.extract_strided_slice %8 {offsets = [0, 1], sizes = [16, 1], strides = [1, 1]} : vector<16x256xf32> to vector<16x1xf32>
      %48 = vector.shape_cast %46 : vector<1x256xi1> to vector<1x256xi1>
      %49 = vector.broadcast %48 : vector<1x256xi1> to vector<16x256xi1>
      %50 = vector.shape_cast %47 : vector<16x1xf32> to vector<16x1xf32>
      %51 = vector.broadcast %50 : vector<16x1xf32> to vector<16x256xf32>
      %52 = arith.select %49, %51, %39 : vector<16x256xi1>, vector<16x256xf32>
      %c0_i32_14 = arith.constant 0 : i32
      %53 = arith.subi %c0_i32_14, %5 : i32
      %c1_i32_15 = arith.constant 1 : i32
      %54 = arith.cmpi sgt, %53, %c1_i32_15 : i32
      %c256_i32_16 = arith.constant 256 : i32
      %55 = arith.addi %c256_i32_16, %5 : i32
      %c1_i32_17 = arith.constant 1 : i32
      %56 = arith.addi %55, %c1_i32_17 : i32
      %57 = vector.broadcast %56 : i32 to vector<1x256xi32>
      %58 = arith.cmpi eq, %1, %57 : vector<1x256xi32>
      %59 = vector.broadcast %54 : i1 to vector<1x256xi1>
      %60 = arith.andi %59, %58 : vector<1x256xi1>
      %61 = vector.extract_strided_slice %8 {offsets = [0, 254], sizes = [16, 1], strides = [1, 1]} : vector<16x256xf32> to vector<16x1xf32>
      %62 = vector.shape_cast %60 : vector<1x256xi1> to vector<1x256xi1>
      %63 = vector.broadcast %62 : vector<1x256xi1> to vector<16x256xi1>
      %64 = vector.shape_cast %61 : vector<16x1xf32> to vector<16x1xf32>
      %65 = vector.broadcast %64 : vector<16x1xf32> to vector<16x256xf32>
      %66 = arith.select %63, %65, %52 : vector<16x256xi1>, vector<16x256xf32>
      %67 = arith.index_cast %arg4 : i32 to index
      %c0_18 = arith.constant 0 : index
      %c0_19 = arith.constant 0 : index
      %68 = vector.load %arg3[%67, %c0_18, %c0_19] : memref<2x16x256xf32, #tpu.memory_space<vmem>>, vector<1x16x256xf32>
      %69 = vector.shape_cast %68 : vector<1x16x256xf32> to vector<16x256xf32>
      %70 = vector.shape_cast %66 : vector<16x256xf32> to vector<1x16x256xf32>
      tpu.vector_store %arg3[%67, %c0_18, %c0_19], %70 {strides = array<i32>} : memref<2x16x256xf32, #tpu.memory_space<vmem>>, vector<1x16x256xf32>,
    }
    %c2_i32_1 = arith.constant 2 : i32
    return
  }
  func.func @transform_0(%arg0: i32, %arg1: memref<4xi32, #tpu.memory_space<smem>>) -> (i32, i32, i32) {
    %c0_i32 = arith.constant 0 : i32
    %c0_i32_0 = arith.constant 0 : i32
    %c0_i32_1 = arith.constant 0 : i32
    return %arg0, %c0_i32, %c0_i32_0 : i32, i32, i32
  }
  func.func @transform_1(%arg0: i32, %arg1: memref<4xi32, #tpu.memory_space<smem>>) -> (i32, i32, i32) {
    %c0_i32 = arith.constant 0 : i32
    %c0_i32_0 = arith.constant 0 : i32
    %c0_i32_1 = arith.constant 0 : i32
    return %arg0, %c0_i32, %c0_i32_0 : i32, i32, i32
  }
}

</mosaic_0001>

<bundles_post_ra>
// kernel: tpu_custom_call.1
= control target key start
LH: loop header
LB: loop body
LE: loop exit
PB: predicated region body
PF: predicated region fallthrough
CT: control target
= control target key end

     0   :  { %s972_s0 = inlined_call_operand.hbm [shape: s32[4], index: 0, kind: input, shape index: {}]   ;;  %s973_s1 = inlined_call_operand.hbm [shape: f32[4,16,256], index: 1, kind: input, shape index: {}]   ;;  %s974_s2 = inlined_call_operand.hbm [shape: f32[4,16,256], index: 2, kind: output, shape index: {}]  }
   0x1   :  { %s497_s11 = scalar_lea.hbm %s972_s0, 16 }
   0x2   :  { %p498_p0 = scmp.ne.s32.totalorder %s972_s0, %s497_s11  ;;  %p501_p1 = scmp.lt.u32.totalorder %s497_s11, %s972_s0 }
   0x4   :  { %p503_p2 = pnand %p501_p1, %p498_p0 }
   0x6   :  { %506 = shalt.err (!%p503_p2)  }
   0x7   :  { %s615_s16 = smov [#allocation3]  }
   0x8   :  { %8 = dma.hbm_to_smem %s972_s0, 16, %s615_s16, [#allocation2] }
   0x9   :  { %585 = dma.done.wait [#allocation2], 16 }
   0xa   :  { %586 = vsyncadd [#allocation2], 4294967280 }
   0xb   :  { %10 = sfence }
   0xc   :  { %11 = vsyncpa [#allocation5], 0 }
   0xd   :  { %13 = vsyncpa [#allocation5 + $0x1], 0 }
   0xe   :  { %14 = vsyncpa [#allocation6], 0 }
   0xf   :  { %16 = vsyncpa [#allocation6 + $0x1], 0  ;;  %s653_s19 = smov 0   ;;  %s655_s20 = smov 0  }
  0x10   :  { %s657_s21 = smov 0   ;;  %s659_s22 = smov 0  }
  0x11 LB: > { %s674_s0 = sadd.s32 4294967295, %s609_s22   ;;  %s400_s23 = sadd.s32 4294967294, %s609_s22   ;;  %s609_s22 = sphi %s659_s22, %s1006_s22   ;;  %s605_s21 = sphi %s657_s21, %s1005_s21   ;;  %s601_s20 = sphi %s655_s20, %s1004_s20   ;;  %s597_s19 = sphi %s653_s19, %s1003_s19  }
  0x12   : > { %s678_s24 = sadd.s32 1, %s609_s22   ;;  %s29_s25 = sadd.s32 1, %s605_s21 }
  0x13   : > { %s26_s26 = ssub.s32 %s609_s22, %s678_s24  ;;  %p36_p3 = scmp.ne.s32.totalorder %s605_s21, %s601_s20 }
  0x14   : > { %p27_p4 = scmp.eq.s32.totalorder %s26_s26, 0  ;;  %p37_p5 = scmp.eq.s32.totalorder %s609_s22, 0 }
  0x15   : > { %p42_p6 = scmp.ne.s32.totalorder %s601_s20, %s597_s19  ;;  %p43_p7 = scmp.eq.s32.totalorder %s674_s0, 0 }
  0x16   : > { %s690_s27 = scalar_select %p27_p4, %s605_s21, %s29_s25  }
  0x17   : > { %p692_p8 = por %p37_p5, %p36_p3  ;;  %p696_p9 = por %p43_p7, %p42_p6 }
  0x18   : > { %p66_p10 = scmp.eq.s32.totalorder %s674_s0, 1  ;;  %p72_p11 = scmp.eq.s32.totalorder %s400_s23, 1 }
  0x19   : > { %p440_p13 = scmp.lt.s32.totalorder %s609_s22, 2  ;;  %s92_s4 = sand.u32 1, %s605_s21  }
  0x1a   : > { %p703_p0 = por %p66_p10, %p36_p3  ;;  %p707_p1 = por %p72_p11, %p42_p6 }
  0x1b   : > { %s423_s5 = sshll.u32 %s609_s22, 10  ;;  %s403_s6 = sshll.u32 %s92_s4, 6 }
  0x1c   : > { %s978_s30 = scalar_select %p703_p0, 1, 0 }
  0x1d   : > { %s979_s3 = scalar_select %p707_p1, 1, 0 }
  0x1e   : > { %s716_s9 = scalar_lea.hbm %s973_s1, %s423_s5  ;;  %s96_s10 = scalar_lea.vmem [#allocation4], %s403_s6 }
  0x1f   : > { %s104_s11 = sshll.u32 %s96_s10, 4  ;;  %p720_p2 = pnand %p440_p13, %p692_p8  ;;  %s724_s11 = int_to_ptr.vmem [resolvable:$true] %s104_s11 }
  0x20   : > { %s726_s13 = scalar_lea.sflag [#allocation5], %s92_s4  ;;  %s507_s14 = scalar_lea.hbm %s716_s9, 1024 }
  0x21   : > { %p508_p3 = scmp.ne.s32.totalorder %s716_s9, %s507_s14  ;;  %p509_p4 = pneg %p720_p2 }
  0x22   : > { %s512_s17 = scalar_lea.hbm %s973_s1, 2048  ;;  %p513_p7 = scmp.lt.u32.totalorder %s716_s9, %s973_s1 }
  0x23   : > { %p510_p5 = pnand %p509_p4, %p508_p3  ;;  %p514_p8 = scmp.lt.u32.totalorder %s512_s17, %s507_s14 }
  0x24   : > { %p516_p11 = scmp.lt.u32.totalorder %s507_s14, %s716_s9 }
  0x25   : > { %p511_p6 = pneg %p510_p5  ;;  %p515_p10 = por %p514_p8, %p513_p7 }
  0x27   : > { %p517_p13 = por %p516_p11, %p515_p10 }
  0x29   : > { %p518_p12 = pnand %p517_p13, %p511_p6 }
  0x2b   : > { %521 = shalt.err (!%p518_p12)
}
  0x2c   : > { %s522_s25 = scalar_lea.vmem %s724_s11, 1024  ;;  %s616_s26 = smov [#allocation4]  }
  0x2d   : > { %p523_p3 = scmp.ne.s32.totalorder %s724_s11, %s522_s25  ;;  %s527_s28 = sshll.u32 %s616_s26, 4  ;;  %s528_s28 = int_to_ptr.vmem [resolvable:$false] %s527_s28 }
  0x2e   : > { %s529_s4 = scalar_lea.vmem %s528_s28, 2048  ;;  %p530_p0 = scmp.lt.s32.totalorder %s724_s11, %s528_s28 }
  0x2f   : > { %p525_p5 = pnand %p523_p3, %p509_p4  ;;  %p531_p7 = scmp.lt.s32.totalorder %s529_s4, %s522_s25 }
  0x31   : > { %p526_p1 = pneg %p525_p5  ;;  %p532_p8 = por %p531_p7, %p530_p0 }
  0x33   : > { %p533_p10 = pnand %p532_p8, %p526_p1 }
  0x35   : > { %536 = shalt.err (!%p533_p10)
}
  0x36   : > { %s617_s5 = smov 256   ;;  %s618_s6 = smov 16  }
  0x37   : > { %435 = dma.hbm_to_vmem [thread:$0]  (!%p720_p2), %s716_s9, 1024, %s724_s11, %s726_s13, %s617_s5, %s617_s5, %s618_s6  }
  0x38   : > { %p407_p12 = scmp.ge.s32.totalorder %s609_s22, 1  ;;  %p112_p4 = scmp.lt.s32.totalorder %s609_s22, 3 }
  0x3a   : > { %p113_p6 = pnand %p407_p12, %p112_p4 }
  0x3b   : > { %s757_s7 = sand.u32 (!%p113_p6), 1, %s601_s20  }
  0x3c   : > { %116 = sbr.rel (%p113_p6) target bundleno = 251 (0xfb), region = 24  ;;  %s408_s8 = sshll.u32 (!%p113_p6), %s757_s7, 6 }
  0x3d   : > { %s119_s10 = scalar_lea.sflag (!%p113_p6), [#allocation5], %s757_s7  ;;  %s761_s14 = scalar_lea.vmem (!%p113_p6), [#allocation4], %s408_s8 }
  0x43   : > { %588 = dma.done.wait (%p696_p9), %s119_s10, 1024  }
  0x44   : > { %590 = vsyncadd (%p696_p9), %s119_s10, 4294966272  ;;  %s410_s9 = sshll.u32 %s674_s0, 1  ;;  %v144_v0 = vlaneseq  ;;  %s773_s11 = scalar_lea.vmem [#allocation7], %s408_s8 }
  0x45   : > { %s775_s12 = smov 0  }
  0x46   : > { %v768_v1 = vand.u32 127, %v144_v0 }
  0x48   : > { %v771_v2 = vadd.s32 128, %v768_v1 }
  0x49 LB: >> { %v619_v3 = vmov 127   ;;  %v620_v4 = vmov 0   ;;  %s424_s29 = sshll.u32 %s613_s12, 5  ;;  %s153_s13 = sadd.s32 %s613_s12, %s410_s9  ;;  %v621_v9 = vmov 1   ;;  %v622_v10 = vmov 126   ;;  %s613_s12 = sphi %s775_s12, %s152_s12  }
  0x4a   : >> { %492 = vset.pattern.permute.xlu1 %v619_v3  ;;  %491 = vset.pattern.permute.xlu0 %v620_v4  ;;  %s157_s15 = scalar_lea.vmem %s761_s14, %s424_s29 [#allocation4]  ;;  %s787_s16 = sld [smem:[#allocation3 + %s153_s13]] }
  0x4b   : >> { %v159_v5 = vld [vmem:[%s157_s15 + $0x8] sm:$0xff]  ;;  %v158_v6 = vld [vmem:[%s157_s15] sm:$0xff]  ;;  %v161_v7 = vld [vmem:[%s157_s15 + $0x18] sm:$0xff]  ;;  %s152_s12 = sadd.s32 1, %s613_s12  }
  0x4c   : >> { %233 = vperm.xlu1 %492, %v159_v5   ;;  %205 = vperm.xlu0 %491, %v158_v6   ;;  %v160_v8 = vld [vmem:[%s157_s15 + $0x10] sm:$0xff]  ;;  %p149_p13 = scmp.ge.s32.totalorder %s152_s12, 2  }
  0x4d   : > { %p1000_p5 = scmp.ne.s32.totalorder (%p149_p13), %s978_s30, 0  ;;  %s623_s14 = smov (%p149_p13), [#allocation7]  }
  0x4e   : > { %s541_s9 = sshll.u32 (%p149_p13), %s623_s14, 4  ;;  %s542_s9 = int_to_ptr.vmem [resolvable:$false] %s541_s9 }
  0x50   : >> { %238 = vperm.xlu1 %492, %v161_v7   ;;  %210 = vperm.xlu0 %491, %v160_v8   ;;  %p162_p9 = scmp.lt.s32.totalorder %s787_s16, 0  ;;  %s163_s17 = sadd.s32 256, %s787_s16 }
  0x51   : >> { %s217_s25 = ssub.s32 0, %s787_s16  ;;  %v219_v11 = vstv %s163_s17  ;;  %p189_p1 = scmp.gt.s32.totalorder %s787_s16, 0 }
  0x52   : >> { %s792_s18 = scalar_select %p162_p9, %s163_s17, %s787_s16  ;;  %vm220_vm0 = vcmp.eq.s32.totalorder %v768_v1, %v219_v11  ;;  %vm221_vm1 = vcmp.eq.s32.totalorder %v771_v2, %v219_v11 }
  0x53   : >> { %p218_p0 = scmp.gt.s32.totalorder %s217_s25, 0  ;;  %p245_p2 = scmp.gt.s32.totalorder %s787_s16, 1 }
  0x54   : >> { %494 = vset.pattern.permute.xlu1 %v621_v9  ;;  %493 = vset.pattern.permute.xlu0 %v621_v9  ;;  %s165_s23 = sand.u32 255, %s792_s18   ;;  %p818_p11 = scmp.gt.s32.totalorder %s217_s25, 1 }
  0x55   : >> { %264 = vperm.xlu1 %494, %v160_v8   ;;  %260 = vperm.xlu0 %493, %v158_v6   ;;  %s796_s26 = sand.u32 127, %s165_s23   ;;  %s167_s6 = sshrl.u32 %s165_s23, 7 }
  0x56   : >> { %s222_s28 = scalar_select %p218_p0, 1, 0  ;;  %v176_v25 = vstv %s796_s26 }
  0x57   : >> { %s194_s4 = scalar_select %p189_p1, 1, 0  ;;  %vm839_vm12 = vcmp.lt.s32.totalorder %v768_v1, %v176_v25 }
  0x58   : >> { %v223_v12 = vstv %s222_s28  ;;  %s413_s8 = sadd.s32 4294967295, %s787_s16  ;;  %s414_s13 = sadd.s32 4294967294, %s787_s16 }
  0x59   : >> { %495 = vset.pattern.permute.xlu1 %v622_v10  ;;  %496 = vset.pattern.permute.xlu0 %v622_v10  ;;  %vm224_vm2 = vcmp.eq.s32.totalorder %v223_v12, 1  ;;  %s250_s10 = scalar_select %p245_p2, 1, 0  ;;  %v191_v21 = vstv %s413_s8  ;;  %v195_v22 = vstv %s194_s4  ;;  %v247_v23 = vstv %s414_s13 }
  0x5a   : >> { %286 = vperm.xlu1 %495, %v159_v5   ;;  %290 = vperm.xlu0 %496, %v161_v7   ;;  %vm802_vm3 = vmand %vm224_vm2, %vm220_vm0  ;;  %s276_s15 = scalar_select %p818_p11, 1, 0  ;;  %vm192_vm5 = vcmp.eq.s32.totalorder %v768_v1, %v191_v21  ;;  %vm196_vm6 = vcmp.eq.s32.totalorder %v195_v22, 1  ;;  %vm193_vm7 = vcmp.eq.s32.totalorder %v771_v2, %v191_v21  ;;  %vm248_vm8 = vcmp.eq.s32.totalorder %v768_v1, %v247_v23 }
  0x5b   : >> { %vm807_vm4 = vmand %vm224_vm2, %vm221_vm1  ;;  %s182_s17 = sand.u32 1, %s167_s6  ;;  %s272_s18 = sadd.s32 257, %s787_s16  ;;  %v251_v24 = vstv %s250_s10  ;;  %vm249_vm11 = vcmp.eq.s32.totalorder %v771_v2, %v247_v23 }
  0x5c   : >> { %v183_v28 = vstv %s182_s17  ;;  %v273_v29 = vstv %s272_s18  ;;  %v277_v30 = vstv %s276_s15  ;;  %vm252_vm9 = vcmp.eq.s32.totalorder %v251_v24, 1  ;;  %vm833_vm10 = vmand %vm196_vm6, %vm192_vm5  ;;  %s298_s16 = scalar_lea.vmem %s773_s11, %s424_s29 [#allocation7]  ;;  %s427_s29 = sshll.u32 (%p149_p13), %s674_s0, 10 }
  0x5d   : >> { %vm184_vm13 = vcmp.ne.s32.totalorder %v183_v28, 0  ;;  %vm843_vm14 = vmand %vm196_vm6, %vm193_vm7  ;;  %vm274_vm15 = vcmp.eq.s32.totalorder %v768_v1, %v273_v29  ;;  %vm278_vm0 = vcmp.eq.s32.totalorder %v277_v30, 1  ;;  %vm275_vm2 = vcmp.eq.s32.totalorder %v771_v2, %v273_v29  ;;  %s318_s28 = sshll.u32 (%p149_p13), %s773_s11, 4  ;;  %s304_s4 = scalar_lea.sflag (%p149_p13), [#allocation6], %s757_s7  ;;  %s928_s28 = int_to_ptr.vmem [resolvable:$true] %s318_s28 }
  0x5e   : >> { %172 = vrot.lane.b32.xlu0 %v159_v5, %s796_s26  ;;  %168 = vrot.lane.b32.xlu1 %v158_v6, %s796_s26  ;;  %vm848_vm1 = vmand %vm252_vm9, %vm248_vm8  ;;  %s537_s5 = scalar_lea.vmem (%p149_p13), %s928_s28, 1024  ;;  %s543_s0 = scalar_lea.vmem (%p149_p13), %s542_s9, 2048 }
  0x5f   : >> { %vm853_vm5 = vmand %vm252_vm9, %vm249_vm11  ;;  %p538_p3 = scmp.ne.s32.totalorder (%p149_p13), %s928_s28, %s537_s5  ;;  %p544_p10 = scmp.lt.s32.totalorder (%p149_p13), %s928_s28, %s542_s9 }
  0x60   : >> { %vm861_vm6 = vmand %vm278_vm0, %vm274_vm15  ;;  %p545_p12 = scmp.lt.s32.totalorder (%p149_p13), %s543_s0, %s537_s5 }
  0x61   : >> { %vm867_vm7 = vmand %vm278_vm0, %vm275_vm2  ;;  %p539_p7 = pnand (%p149_p13), %p538_p3, %p1000_p5 }
  0x62   : >> { %170 = vrot.lane.b32.xlu1 %v160_v8, %s796_s26  ;;  %p546_p4 = por (%p149_p13), %p545_p12, %p544_p10 }
  0x63   : > { %p540_p8 = pneg (%p149_p13), %p539_p7 }
  0x65   : > { %p547_p6 = pnand (%p149_p13), %p546_p4, %p540_p8 }
  0x66   : >> { %174 = vrot.lane.b32.xlu1 %v161_v7, %s796_s26  ;;  %s925_s26 = scalar_lea.hbm (%p149_p13), %s974_s2, %s427_s29 }
  0xcb   : >> { %v234_v15 = vpop.permute.xlu1 %233  ;;  %v206_v16 = vpop.permute.xlu0 %205 }
  0xcf   : >> { %v813_v17 = vpop.permute.xlu1 %238  ;;  %v815_v18 = vpop.permute.xlu0 %210 }
  0xd4   : >> { %v823_v19 = vpop.permute.xlu1 %264  ;;  %v261_v20 = vpop.permute.xlu0 %260 }
  0xd9   : >> { %v287_v26 = vpop.permute.xlu1 %286  ;;  %v291_v27 = vpop.permute.xlu0 %290 }
  0xdd   : >> { %v173_v34 = vpop.permute.xlu0 %172  ;;  %v169_v36 = vpop.permute.xlu1 %168 }
  0xde   : >> { %v178_v38 = vsel %vm839_vm12, %v169_v36, %v173_v34  ;;  %v180_v39 = vsel %vm839_vm12, %v173_v34, %v169_v36 }
  0xdf   : >> { %v185_v41 = vsel %vm184_vm13, %v178_v38, %v180_v39  ;;  %v186_v42 = vsel %vm184_vm13, %v180_v39, %v178_v38 }
  0xe0   : >> { %v213_v44 = vsel %vm833_vm10, %v206_v16, %v185_v41  ;;  %v214_v45 = vsel %vm843_vm14, %v206_v16, %v186_v42 }
  0xe1   : >> { %v241_v46 = vsel %vm802_vm3, %v234_v15, %v213_v44  ;;  %v242_v47 = vsel %vm807_vm4, %v234_v15, %v214_v45  ;;  %v171_v48 = vpop.permute.xlu1 %170 }
  0xe2   : >> { %v267_v49 = vsel %vm848_vm1, %v261_v20, %v241_v46  ;;  %v268_v50 = vsel %vm853_vm5, %v261_v20, %v242_v47 }
  0xe3   : >> { %v293_v51 = vsel %vm861_vm6, %v287_v26, %v267_v49  ;;  %v294_v52 = vsel %vm867_vm7, %v287_v26, %v268_v50 }
  0xe4   : >> { %299 = vst [vmem:[%s298_s16] sm:$0xff] %v293_v51  ;;  %300 = vst [vmem:[%s298_s16 + $0x8] sm:$0xff] %v294_v52 }
  0xe5   : >> { %v175_v53 = vpop.permute.xlu1 %174 }
  0xe6   : >> { %v179_v54 = vsel %vm839_vm12, %v171_v48, %v175_v53  ;;  %v181_v55 = vsel %vm839_vm12, %v175_v53, %v171_v48  ;;  %151 = sbr.rel (!%p149_p13) target bundleno = 73 (0x49), region = 78 }
  0xe7   : >> { %v187_v56 = vsel %vm184_vm13, %v179_v54, %v181_v55  ;;  %v188_v57 = vsel %vm184_vm13, %v181_v55, %v179_v54 }
  0xe8   : >> { %v215_v58 = vsel %vm833_vm10, %v815_v18, %v187_v56  ;;  %v216_v59 = vsel %vm843_vm14, %v815_v18, %v188_v57 }
  0xe9   : >> { %v243_v60 = vsel %vm802_vm3, %v813_v17, %v215_v58  ;;  %v244_v61 = vsel %vm807_vm4, %v813_v17, %v216_v59 }
  0xea   : >> { %v269_v62 = vsel %vm848_vm1, %v823_v19, %v243_v60  ;;  %v270_v63 = vsel %vm853_vm5, %v823_v19, %v244_v61 }
  0xeb   : >> { %v295_v0 = vsel %vm861_vm6, %v291_v27, %v269_v62  ;;  %v296_v3 = vsel %vm867_vm7, %v291_v27, %v270_v63 }
  0xec   : >> { %301 = vst [vmem:[%s298_s16 + $0x10] sm:$0xff] %v295_v0  ;;  %302 = vst [vmem:[%s298_s16 + $0x18] sm:$0xff] %v296_v3 }
  0xed   : > { %550 = shalt.err (!%p547_p6)
}
  0xee   : > { %s551_s11 = scalar_lea.hbm %s925_s26, 1024  ;;  %s555_s8 = scalar_lea.hbm %s974_s2, 2048 }
  0xef   : > { %p552_p9 = scmp.ne.s32.totalorder %s925_s26, %s551_s11  ;;  %p556_p2 = scmp.lt.u32.totalorder %s925_s26, %s974_s2 }
  0xf0   : > { %p557_p11 = scmp.lt.u32.totalorder %s555_s8, %s551_s11  ;;  %p559_p3 = scmp.lt.u32.totalorder %s551_s11, %s925_s26 }
  0xf1   : > { %p553_p0 = pnand %p552_p9, %p1000_p5 }
  0xf2   : > { %p558_p13 = por %p557_p11, %p556_p2 }
  0xf3   : > { %p554_p1 = pneg %p553_p0 }
  0xf4   : > { %p560_p7 = por %p559_p3, %p558_p13 }
  0xf6   : > { %p561_p8 = pnand %p560_p7, %p554_p1 }
  0xf8   : > { %564 = shalt.err (!%p561_p8)
}
  0xf9   : > { %s624_s15 = smov 256   ;;  %s625_s17 = smov 16  }
  0xfa   : > { %430 = dma.vmem_to_hbm [thread:$0]  (%p1000_p5), %s928_s28, 1024, %s925_s26, %s304_s4, %s624_s15, %s624_s15, %s625_s17  }
  0xfb PF: > { %s333_s18 = sand.u32 1, %s597_s19   ;;  %p1001_p10 = scmp.ne.s32.totalorder %s979_s3, 0 }
  0xfc   : > { %p1002_p12 = scmp.ge.s32.totalorder %s609_s22, 2  ;;  %s334_s16 = scalar_lea.sflag [#allocation6], %s333_s18 }
  0xfe   : > { %p437_p4 = pnand %p1002_p12, %p1001_p10 }
 0x100   : > { %592 = dma.done.wait (!%p437_p4), %s334_s16, 1024  }
 0x101   : > { %594 = vsyncadd (!%p437_p4), %s334_s16, 4294966272  ;;  %p19_p6 = scmp.ge.s32.totalorder %s678_s24, 4   ;;  %s1003_s19 = smov %s601_s20 }
 0x102   : > { %s1004_s20 = smov %s605_s21  ;;  %s1005_s21 = smov %s690_s27 }
 0x103   : > { %s1006_s22 = smov %s678_s24  ;;  %21 = sbr.rel (!%p19_p6) target bundleno = 17 (0x11), region = 89 }
 0x10a   :  { %339 = vsyncpa [#allocation5], 1 }
 0x10b   :  { %341 = vsyncpa [#allocation5 + $0x1], 1 }
 0x10c   :  { %342 = vsyncpa [#allocation6], 1 }
 0x10d   :  { %344 = vsyncpa [#allocation6 + $0x1], 1 }

</bundles_post_ra>
